<compile_context>
chip_gen: v6e
topology: v6e:2x2x1
jax: 0.10.0
libtpu: 0.0.40
codegen_flags: <defaults>
</compile_context>

<pallas_src>
import jax
import jax.numpy as jnp
from jax import lax
from jax.experimental import pallas as pl
from jax.experimental.pallas import tpu as pltpu


def _make_pooler_kernel(use_bf16):
    def _pooler_kernel(x_ref, w_ref, b_ref, o_ref, acc_ref):
        k = pl.program_id(2)

        @pl.when(k == 0)
        def _init():
            acc_ref[...] = jnp.zeros_like(acc_ref)

        x = x_ref[...]          # (tb, tk)
        w = w_ref[...]          # (tn, tk)  -- native nn.Linear (out, in) layout
        if use_bf16:
            x = x.astype(jnp.bfloat16)
            w = w.astype(jnp.bfloat16)

        # x @ W^T without any transpose: contract x dim 1 with w dim 1.
        acc_ref[...] += lax.dot_general(
            x, w,
            dimension_numbers=(((1,), (1,)), ((), ())),
            preferred_element_type=jnp.float32,
        )

        @pl.when(k == pl.num_programs(2) - 1)
        def _finalize():
            y = acc_ref[...] + b_ref[...]          # bias broadcast over batch (f32)
            o_ref[...] = jnp.tanh(y).astype(o_ref.dtype)   # tanh -> EUP slot, free

    return _pooler_kernel


def _pick_tile(dim, preferred, align):
    """Largest aligned tile <= preferred that evenly divides dim, else full dim."""
    if dim <= preferred:
        return dim
    for t in range(preferred, align - 1, -align):
        if dim % t == 0:
            return t
    return dim


def output_pooler(x, weight, bias, *, use_bf16=True):
    """x: (B, 1, H); weight: (H, H) PyTorch (out, in) layout; bias: (H,)."""
    # TODO(synk): in a real model, store `weight` pre-cast to bf16 at parameter
    # load time so weight HBM traffic is halved; here we cast tiles in-kernel.
    x2d = jnp.squeeze(x, axis=1)        # (B, H)  -- metadata-only reshape
    b2d = bias.reshape(1, -1)           # (1, H)

    B, H = x2d.shape
    Hout, Hin = weight.shape
    assert Hin == H and Hout == H

    tb = _pick_tile(B, 256, 8)          # batch tile (sublanes)
    tn = _pick_tile(Hout, 512, 128)     # output-feature tile (lanes, 128-dense)
    tk = _pick_tile(Hin, 512, 128)      # reduction tile

    grid = (pl.cdiv(B, tb), Hout // tn, Hin // tk)

    return pl.pallas_call(
        _make_pooler_kernel(use_bf16),
        out_shape=jax.ShapeDtypeStruct((B, H), x2d.dtype),
        grid_spec=pltpu.PrefetchScalarGridSpec(
            num_scalar_prefetch=0,
            grid=grid,
            in_specs=[
                # x: varies with (b, k); invariant over n.
                pl.BlockSpec((tb, tk), lambda b, n, k: (b, k)),
                # W: native (out, in); invariant over b -> stays resident when
                # the whole weight fits a single (n, k) block.
                pl.BlockSpec((tn, tk), lambda b, n, k: (n, k)),
                # bias: (1, tn), only needed at finalize.
                pl.BlockSpec((1, tn), lambda b, n, k: (0, n)),
            ],
            out_specs=pl.BlockSpec((tb, tn), lambda b, n, k: (b, n)),
            scratch_shapes=[pltpu.VMEM((tb, tn), jnp.float32)],
        ),
        compiler_params=pltpu.CompilerParams(
            # B and N independent (v7x megacore sharding); K is the reduction.
            dimension_semantics=("parallel", "parallel", "arbitrary"),
            # Headroom for double-buffered tiles; safe on v5e/v6e (128 MiB)
            # and v7x (64 MiB physical VMEM).
            vmem_limit_bytes=48 * 1024 * 1024,
        ),
    )(x2d, weight, b2d)


if __name__ == "__main__":
    # Toy shapes consistent with the module. Note: at B=2, H=32 the pallas_call
    # overhead dominates; the kernel only pays off at production B/H.
    B, H = 2, 32

    key = jax.random.PRNGKey(0)
    kx, kw, kb = jax.random.split(key, 3)

    x = jax.random.normal(kx, (B, 1, H), dtype=jnp.float32)
    weight = jax.random.normal(kw, (H, H), dtype=jnp.float32) * 0.1   # (out, in)
    bias = jax.random.normal(kb, (H,), dtype=jnp.float32) * 0.1

    out = jax.block_until_ready(output_pooler(x, weight, bias))

    # Reference in plain JAX (f32). bf16 MXU inputs with f32 accumulation keep
    # the error well under the tolerance at these magnitudes.
    ref = jnp.tanh(jnp.squeeze(x, axis=1) @ weight.T + bias)
    assert out.shape == (B, H)
    assert jnp.allclose(out, ref, atol=2e-2, rtol=2e-2), float(
        jnp.max(jnp.abs(out - ref)))

    print("KERNEL_OK")
</pallas_src>

<mosaic_0001>
module attributes {stable_mosaic.version = 11 : i64} {
  func.func @_pooler_kernel(%arg0: i32, %arg1: i32, %arg2: i32, %arg3: memref<2x32xf32, #tpu.memory_space<vmem>>, %arg4: memref<32x32xf32, #tpu.memory_space<vmem>>, %arg5: memref<1x32xf32, #tpu.memory_space<vmem>>, %arg6: memref<2x32xf32, #tpu.memory_space<vmem>>, %arg7: memref<2x32xf32, #tpu.memory_space<vmem>>) attributes {dimension_semantics = [#tpu.dimension_semantics<parallel>, #tpu.dimension_semantics<parallel>, #tpu.dimension_semantics<arbitrary>], iteration_bounds = array<i64: 1, 1, 1>, scalar_prefetch = 0 : i64, scratch_operands = 1 : i64, tpu.core_type = #tpu.core_type<tc>, window_params = [{transform_indices = @transform_0, window_bounds = array<i64: 2, 32>}, {transform_indices = @transform_1, window_bounds = array<i64: 32, 32>}, {transform_indices = @transform_2, window_bounds = array<i64: 1, 32>}, {transform_indices = @transform_3, window_bounds = array<i64: 2, 32>}]} {
    %c0_i32 = arith.constant 0 : i32
    %0 = arith.cmpi eq, %arg2, %c0_i32 : i32
    %1 = arith.extui %0 : i1 to i32
    %c0_i32_0 = arith.constant 0 : i32
    %2 = arith.cmpi ne, %1, %c0_i32_0 : i32
    scf.if %2 {
      %cst_10 = arith.constant 0.000000e+00 : f32
      %14 = vector.broadcast %cst_10 : f32 to vector<2x32xf32>
      %c0_11 = arith.constant 0 : index
      %c0_12 = arith.constant 0 : index
      %15 = vector.load %arg7[%c0_11, %c0_12] : memref<2x32xf32, #tpu.memory_space<vmem>>, vector<2x32xf32>
      tpu.vector_store %arg7[%c0_11, %c0_12], %14 {strides = array<i32>} : memref<2x32xf32, #tpu.memory_space<vmem>>, vector<2x32xf32>,
    } else {
    }
    %c0 = arith.constant 0 : index
    %c0_1 = arith.constant 0 : index
    %3 = vector.load %arg3[%c0, %c0_1] : memref<2x32xf32, #tpu.memory_space<vmem>>, vector<2x32xf32>
    %c0_2 = arith.constant 0 : index
    %c0_3 = arith.constant 0 : index
    %4 = vector.load %arg4[%c0_2, %c0_3] : memref<32x32xf32, #tpu.memory_space<vmem>>, vector<32x32xf32>
    %5 = arith.truncf %3 : vector<2x32xf32> to vector<2x32xbf16>
    %6 = arith.truncf %4 : vector<32x32xf32> to vector<32x32xbf16>
    %c0_4 = arith.constant 0 : index
    %c0_5 = arith.constant 0 : index
    %7 = vector.load %arg7[%c0_4, %c0_5] : memref<2x32xf32, #tpu.memory_space<vmem>>, vector<2x32xf32>
    %cst = arith.constant dense<0.000000e+00> : vector<2x32xf32>
    %8 = tpu.matmul %5, %6, %cst {dimension_numbers = #tpu.dot_dimension_numbers<[1], [1], [0], [0], [0, 0, 1, 0], [], []>} : vector<2x32xbf16>, vector<32x32xbf16>, vector<2x32xf32> -> vector<2x32xf32>
    %9 = arith.addf %7, %8 : vector<2x32xf32>
    %c0_6 = arith.constant 0 : index
    %c0_7 = arith.constant 0 : index
    %10 = vector.load %arg7[%c0_6, %c0_7] : memref<2x32xf32, #tpu.memory_space<vmem>>, vector<2x32xf32>
    tpu.vector_store %arg7[%c0_6, %c0_7], %9 {strides = array<i32>} : memref<2x32xf32, #tpu.memory_space<vmem>>, vector<2x32xf32>,
    %c0_i32_8 = arith.constant 0 : i32
    %11 = arith.cmpi eq, %arg2, %c0_i32_8 : i32
    %12 = arith.extui %11 : i1 to i32
    %c0_i32_9 = arith.constant 0 : i32
    %13 = arith.cmpi ne, %12, %c0_i32_9 : i32
    scf.if %13 {
      %c0_10 = arith.constant 0 : index
      %c0_11 = arith.constant 0 : index
      %14 = vector.load %arg7[%c0_10, %c0_11] : memref<2x32xf32, #tpu.memory_space<vmem>>, vector<2x32xf32>
      %c0_12 = arith.constant 0 : index
      %c0_13 = arith.constant 0 : index
      %15 = vector.load %arg5[%c0_12, %c0_13] : memref<1x32xf32, #tpu.memory_space<vmem>>, vector<1x32xf32>
      %16 = vector.broadcast %15 : vector<1x32xf32> to vector<2x32xf32>
      %17 = arith.addf %14, %16 : vector<2x32xf32>
      %18 = math.tanh %17 : vector<2x32xf32>
      %c0_14 = arith.constant 0 : index
      %c0_15 = arith.constant 0 : index
      %19 = vector.load %arg6[%c0_14, %c0_15] : memref<2x32xf32, #tpu.memory_space<vmem>>, vector<2x32xf32>
      tpu.vector_store %arg6[%c0_14, %c0_15], %18 {strides = array<i32>} : memref<2x32xf32, #tpu.memory_space<vmem>>, vector<2x32xf32>,
    } else {
    }
    return
  }
  func.func @transform_0(%arg0: i32, %arg1: i32, %arg2: i32) -> (i32, i32) {
    %c0_i32 = arith.constant 0 : i32
    return %arg0, %arg2 : i32, i32
  }
  func.func @transform_1(%arg0: i32, %arg1: i32, %arg2: i32) -> (i32, i32) {
    %c0_i32 = arith.constant 0 : i32
    return %arg1, %arg2 : i32, i32
  }
  func.func @transform_2(%arg0: i32, %arg1: i32, %arg2: i32) -> (i32, i32) {
    %c0_i32 = arith.constant 0 : i32
    %c0_i32_0 = arith.constant 0 : i32
    return %c0_i32, %arg1 : i32, i32
  }
  func.func @transform_3(%arg0: i32, %arg1: i32, %arg2: i32) -> (i32, i32) {
    %c0_i32 = arith.constant 0 : i32
    return %arg0, %arg1 : i32, i32
  }
}

</mosaic_0001>

<bundles_post_ra>
// kernel: tpu_custom_call.1
= control target key start
LH: loop header
LB: loop body
LE: loop exit
PB: predicated region body
PF: predicated region fallthrough
CT: control target
= control target key end

     0   :  { %8 = vsyncpa [#allocation4], 0  ;;  %s270_s0 = inlined_call_operand.hbm [shape: f32[2,32], index: 0, kind: input, shape index: {}]   ;;  %s271_s1 = inlined_call_operand.hbm [shape: f32[32,32], index: 1, kind: input, shape index: {}]   ;;  %s272_s2 = inlined_call_operand.vmem [shape: f32[1,32], index: 2, kind: input, shape index: {}]   ;;  %s273_s3 = inlined_call_operand.hbm [shape: f32[2,32], index: 3, kind: output, shape index: {}]  }
   0x1   :  { %9 = vsyncpa [#allocation7], 0 }
   0x2   :  { %10 = vsyncpa [#allocation5], 0  ;;  %s228_s12 = smov [#allocation3]   ;;  %s229_s14 = smov [#allocation6]  }
   0x3   :  { %s17_s13 = sshll.u32 %s228_s12, 4  ;;  %s26_s15 = sshll.u32 %s229_s14, 4  ;;  %s18_s13 = int_to_ptr.vmem [resolvable:$true] %s17_s13  ;;  %s27_s15 = int_to_ptr.vmem [resolvable:$true] %s26_s15 }
   0x4   :  { %s170_s16 = scalar_lea.vmem %s18_s13, 32  ;;  %p175_p1 = scmp.lt.s32.totalorder %s18_s13, %s18_s13 }
   0x5   :  { %p171_p0 = scmp.ne.s32.totalorder %s18_s13, %s170_s16  ;;  %p176_p2 = scmp.lt.s32.totalorder %s170_s16, %s170_s16 }
   0x7   :  { %p177_p3 = por %p176_p2, %p175_p1 }
   0x9   :  { %p178_p4 = pnand %p177_p3, %p171_p0 }
   0xb   :  { %181 = shalt.err (!%p178_p4)
}
   0xc   :  { %20 = dma.hbm_to_vmem [thread:$0]  %s270_s0, 32, %s18_s13, [#allocation4]  }
   0xd   :  { %s190_s19 = scalar_lea.vmem %s27_s15, 512  ;;  %p195_p6 = scmp.lt.s32.totalorder %s27_s15, %s27_s15 }
   0xe   :  { %p191_p5 = scmp.ne.s32.totalorder %s27_s15, %s190_s19  ;;  %p196_p7 = scmp.lt.s32.totalorder %s190_s19, %s190_s19 }
  0x10   :  { %p197_p8 = por %p196_p7, %p195_p6 }
  0x12   :  { %p198_p9 = pnand %p197_p8, %p191_p5 }
  0x14   :  { %201 = shalt.err (!%p198_p9)
}
  0x15   :  { %s230_s20 = smov 128   ;;  %s231_s21 = smov 8  }
  0x16   :  { %32 = dma.hbm_to_vmem [thread:$0]  %s271_s1, 512, %s27_s15, [#allocation7], %s230_s20, %s230_s20, %s231_s21  }
  0x17   :  { %222 = dma.done.wait [#allocation4], 32  }
  0x18   :  { %223 = vsyncadd [#allocation4], 4294967264 }
  0x19   :  { %224 = dma.done.wait [#allocation7], 512  }
  0x1a   :  { %225 = vsyncadd [#allocation7], 4294966784  ;;  %vm46_vm0 = vcmask 254976   ;;  %v232_v0 = vmov 0.0   ;;  %vm233_vm1 = vmmov 0   ;;  %v51_v1 = vld [vmem:[#allocation6 + $0x10] sm:$0xff] }
  0x1b   :  { %145 = vmatprep.subr.bf16.mxu0 %v232_v0  ;;  %149 = vmatprep.mubr.msk.bf16.mxu0 %vm233_vm1, %v232_v0  ;;  %47 = vst.msk [vmem:[#allocation2] sm:$0x3] %vm46_vm0, %v232_v0  ;;  %v52_v2 = vld [vmem:[#allocation6 + $0x18] sm:$0xff]  ;;  %vm57_vm2 = vcmask 261120   ;;  %v49_v4 = vld [vmem:[#allocation6] sm:$0xff]  ;;  %v50_v5 = vld [vmem:[#allocation6 + $0x8] sm:$0xff] }
  0x1c   :  { %v55_v3 = vpack.c.bf16 %v52_v2, %v51_v1  ;;  %v54_v7 = vpack.c.bf16 %v50_v5, %v49_v4  ;;  %v48_v9 = vld [vmem:[#allocation3] sm:$0x3]  ;;  %v141_v17 = vld [vmem:[%s272_s2] ss:$0 sm:$0xff]  ;;  %s234_s24 = smov [#allocation8]  }
  0x1d   :  { %v53_v10 = vpack.c.bf16 %v48_v9, %v48_v9  ;;  %s130_s25 = sshll.u32 %s234_s24, 4  ;;  %s131_s25 = int_to_ptr.vmem [resolvable:$true] %s130_s25 }
  0x1e   :  { %v65_v6 = vsel %vm57_vm2, %v55_v3, 0  ;;  %v62_v8 = vsel %vm57_vm2, %v54_v7, 0  ;;  %s202_s26 = scalar_lea.vmem %s131_s25, 32  ;;  %p207_p11 = scmp.lt.s32.totalorder %s131_s25, %s131_s25 }
  0x1f   :  { %146 = vmatpush3.bf16.xpose.msra.mxu0 %v65_v6  ;;  %p203_p10 = scmp.ne.s32.totalorder %s131_s25, %s202_s26  ;;  %p208_p12 = scmp.lt.s32.totalorder %s202_s26, %s202_s26 }
  0x20   :  { %147 = vmatprep.subr.bf16.mxu0 %v232_v0 }
  0x21   :  { %p209_p13 = por %p208_p12, %p207_p11 }
  0x22   :  { %v56_v11 = vld [vmem:[#allocation2] sm:$0x3] }
  0x23   :  { %p210_p0 = pnand %p209_p13, %p203_p10 }
  0x27   :  { %148 = vmatpush3.bf16.xpose.msra.mxu0 %v62_v8 }
  0x2e   :  { %150 = vmatmul.mubr.msk.bf16.vlgmr.msra.gmra.mxu0 %vm57_vm2, %v53_v10 }
  0xee   :  { %v101_v12 = vpop.f32.mrf.mxu0 }
  0xef   :  { %v107_v13 = vadd.f32 %v101_v12, %v56_v11 }
  0xf0   :  { %v151_v14 = vpop.f32.mrf.mxu0 }
  0xf1   :  { %109 = vst.msk [vmem:[#allocation2] sm:$0x3] %vm46_vm0, %v107_v13 }
  0xf2   :  { %v104_v15 = vpop.f32.mrf.mxu0 }
  0xf4   :  { %v152_v16 = vpop.f32.mrf.mxu0 }
  0xf8   :  { %v113_v18 = vld [vmem:[#allocation2] sm:$0x3] }
  0xf9   :  { %v121_v19 = vadd.f32 %v141_v17, %v113_v18 }
  0xfb   :  { %160 = vtanh.f32 %v121_v19 }
 0x108   :  { %v161_v20 = vpop.eup %160 }
 0x109   :  { %123 = vst.msk [vmem:[#allocation8] sm:$0x3] %vm46_vm0, %v161_v20 }
 0x10a   :  { %213 = shalt.err (!%p210_p0)
}
 0x10b   :  { %133 = dma.vmem_to_hbm [thread:$0]  %s131_s25, 32, %s273_s3, [#allocation5]  }
 0x10c   :  { %226 = dma.done.wait [#allocation5], 32  }
 0x10d   :  { %227 = vsyncadd [#allocation5], 4294967264 }
 0x10e   :  { %137 = vsyncpa [#allocation4], 1 }
 0x10f   :  { %138 = vsyncpa [#allocation7], 1 }
 0x110   :  { %139 = vsyncpa [#allocation5], 1 }

</bundles_post_ra>
